<compile_context>
chip_gen: v5e
topology: v5e:2x2
jax: 0.10.0
libtpu: 0.0.40
codegen_flags: <defaults>
</compile_context>

<pallas_src>
import math

import numpy as np
import jax
import jax.numpy as jnp
from jax import lax
from jax.experimental import pallas as pl
from jax.experimental.pallas import tpu as pltpu


_ACTIVATIONS = {
    "ReLU": lambda x: jnp.maximum(x, 0.0),
    "LeakyReLU": lambda x: jnp.where(x > 0, x, 0.01 * x),
    "Tanh": jnp.tanh,
    "Sigmoid": jax.nn.sigmoid,
    "GELU": jax.nn.gelu,
}


def _make_mlp_kernel(num_layers, act_fn):
    """Fused MLP over one (TN, in_feats) row tile.

    refs = (x_ref, w_0, b_0, ..., w_{L-1}, b_{L-1}, out_ref)
      w_i : (out_i, in_i)   -- PyTorch nn.Linear layout (no pre-transpose)
      b_i : (1, out_i) for hidden layers, (out_L, 1) for the last layer
      out : (num_classes, TN) lane-dense tile
    """

    def kernel(*refs):
        x_ref = refs[0]
        out_ref = refs[-1]
        layer_refs = refs[1:-1]

        h = x_ref[...].astype(jnp.float32)  # (TN, in_feats)
        for i in range(num_layers):
            w = layer_refs[2 * i][...].astype(jnp.float32)
            b = layer_refs[2 * i + 1][...].astype(jnp.float32)
            if i < num_layers - 1:
                # (TN, in_i) . (out_i, in_i)^T -> (TN, out_i)   (MXU, trans_b)
                h = lax.dot_general(
                    h, w, (((1,), (1,)), ((), ())),
                    preferred_element_type=jnp.float32)
                h = act_fn(h + b)                 # b is (1, out_i)
                # TODO(synk): dropout_rate > 0 would need pltpu.prng_seed /
                # prng_random_bits here; module default (0 -> Identity) is what
                # this kernel implements.
            else:
                # lane-dense output tile: (out_i, TN) = W . h^T
                o = lax.dot_general(
                    w, h, (((1,), (1,)), ((), ())),
                    preferred_element_type=jnp.float32)
                out_ref[...] = (o + b).astype(out_ref.dtype)   # b is (C, 1)

    return kernel


def mlp_forward(x, params, *, activation="ReLU", tile_n=1024, out_dtype=None):
    """x: (N, in_feats); params: list of (w, b) with w (out_i, in_i), b (out_i,).

    Returns (N, num_classes), matching the PyTorch MLP.forward on dense
    features (the DGL `h.ndata['feature']` extraction happens outside).
    """
    num_layers = len(params)
    if num_layers == 0:        # module with num_layers == 0 returns input as-is
        return x
    act_fn = _ACTIVATIONS[activation]
    out_dtype = out_dtype or x.dtype

    n, in_feats = x.shape
    num_classes = params[-1][0].shape[0]

    # --- row tiling over N -------------------------------------------------
    if n <= tile_n:
        tn = n                       # single full-extent tile (no (8,128) issue)
        n_pad = n
        x_p = x
    else:
        assert tile_n % 128 == 0, "multi-tile TN must be lane-aligned"
        tn = tile_n
        n_pad = pl.cdiv(n, tn) * tn
        x_p = x if n_pad == n else jnp.pad(x, ((0, n_pad - n), (0, 0)))
    grid = (n_pad // tn,)

    # --- kernel inputs / specs --------------------------------------------
    kernel_inputs = [x_p]
    in_specs = [pl.BlockSpec((tn, in_feats), lambda i: (i, 0))]
    for li, (w, b) in enumerate(params):
        out_i = w.shape[0]
        if li < num_layers - 1:
            b2d = b.reshape(1, out_i)        # row bias for (TN, out_i)
        else:
            b2d = b.reshape(out_i, 1)        # column bias for lane-dense output
        kernel_inputs += [w, b2d]
        # full-array blocks with a constant index_map -> stay VMEM-resident
        in_specs += [
            pl.BlockSpec(w.shape, lambda i: (0, 0)),
            pl.BlockSpec(b2d.shape, lambda i: (0, 0)),
        ]

    out_specs = pl.BlockSpec((num_classes, tn), lambda i: (0, i))
    out_shape = jax.ShapeDtypeStruct((num_classes, n_pad), out_dtype)

    # --- cost estimate (the op is HBM-bound on the (N, in_feats) stream) ---
    flops = 0
    param_bytes = 0
    for w, b in params:
        flops += 2 * n * int(w.shape[0]) * int(w.shape[1])
        param_bytes += (int(w.size) + int(b.size)) * w.dtype.itemsize
    bytes_accessed = (int(x.size) * x.dtype.itemsize
                      + param_bytes
                      + n * num_classes * np.dtype(out_dtype).itemsize)

    # --- VMEM budget: 2x-buffered x/out tiles + resident params + live h ---
    elt = 4
    max_hidden = max(int(w.shape[0]) for w, _ in params)
    budget = (2 * (tn * in_feats * elt + num_classes * tn * elt)
              + 2 * param_bytes
              + tn * max_hidden * elt)
    vmem_limit = int(min(60 * 2**20, max(16 * 2**20, 2 * budget)))

    out = pl.pallas_call(
        _make_mlp_kernel(num_layers, act_fn),
        grid=grid,
        in_specs=in_specs,
        out_specs=out_specs,
        out_shape=out_shape,
        compiler_params=pltpu.CompilerParams(
            dimension_semantics=("parallel",),   # lets v7x shard tiles on 2 TCs
            vmem_limit_bytes=vmem_limit,
        ),
        cost_estimate=pl.CostEstimate(
            flops=flops, transcendentals=0, bytes_accessed=bytes_accessed),
    )(*kernel_inputs)

    return out[:, :n].T                      # (N, num_classes)


def mlp_reference(x, params, activation="ReLU"):
    act = _ACTIVATIONS[activation]
    h = x
    for i, (w, b) in enumerate(params):
        h = h @ w.T + b
        if i != len(params) - 1:
            h = act(h)
    return h


def init_mlp_params(key, in_feats, h_feats=32, num_classes=2, num_layers=2,
                    dtype=jnp.float32):
    """Mirrors the module constructor; w in PyTorch (out, in) layout."""
    if num_layers == 0:
        return []
    if num_layers == 1:
        dims = [(in_feats, num_classes)]
    else:
        dims = [(in_feats, h_feats)]
        dims += [(h_feats, h_feats)] * (num_layers - 2)
        dims += [(h_feats, num_classes)]
    params = []
    for fan_in, fan_out in dims:
        key, kw, kb = jax.random.split(key, 3)
        bound = 1.0 / math.sqrt(fan_in)
        w = jax.random.uniform(kw, (fan_out, fan_in), dtype=dtype,
                               minval=-bound, maxval=bound)
        b = jax.random.uniform(kb, (fan_out,), dtype=dtype,
                               minval=-bound, maxval=bound)
        params.append((w, b))
    return params


if __name__ == "__main__":
    key = jax.random.PRNGKey(0)
    k_p, k_x, k_p3, k_x3 = jax.random.split(key, 4)

    # Default config: 2 layers, single row tile.
    n_nodes, in_feats, h_feats, num_classes = 64, 16, 32, 2
    params = init_mlp_params(k_p, in_feats, h_feats, num_classes, num_layers=2)
    x = jax.random.normal(k_x, (n_nodes, in_feats), dtype=jnp.float32)

    out = mlp_forward(x, params, activation="ReLU")
    jax.block_until_ready(out)
    ref = mlp_reference(x, params, "ReLU")
    assert out.shape == ref.shape == (n_nodes, num_classes)
    assert jnp.allclose(out, ref, atol=1e-4, rtol=1e-4)

    # Multi-tile path (padding + grid > 1) with 3 layers.
    n3 = 300
    params3 = init_mlp_params(k_p3, in_feats, h_feats, num_classes, num_layers=3)
    x3 = jax.random.normal(k_x3, (n3, in_feats), dtype=jnp.float32)
    out3 = mlp_forward(x3, params3, activation="ReLU", tile_n=128)
    jax.block_until_ready(out3)
    ref3 = mlp_reference(x3, params3, "ReLU")
    assert out3.shape == ref3.shape == (n3, num_classes)
    assert jnp.allclose(out3, ref3, atol=1e-4, rtol=1e-4)

    print("KERNEL_OK")
</pallas_src>

<mosaic_0001>
module attributes {stable_mosaic.version = 11 : i64} {
  func.func @kernel(%arg0: i32, %arg1: memref<64x16xf32, #tpu.memory_space<vmem>>, %arg2: memref<32x16xf32, #tpu.memory_space<vmem>>, %arg3: memref<1x32xf32, #tpu.memory_space<vmem>>, %arg4: memref<2x32xf32, #tpu.memory_space<vmem>>, %arg5: memref<2x1xf32, #tpu.memory_space<vmem>>, %arg6: memref<2x64xf32, #tpu.memory_space<vmem>>) attributes {dimension_semantics = [#tpu.dimension_semantics<parallel>], iteration_bounds = array<i64: 1>, scalar_prefetch = 0 : i64, scratch_operands = 0 : i64, tpu.core_type = #tpu.core_type<tc>, window_params = [{transform_indices = @transform_0, window_bounds = array<i64: 64, 16>}, {pipeline_mode = #tpu.pipeline_mode<synchronous>, transform_indices = @transform_1, window_bounds = array<i64: 32, 16>}, {pipeline_mode = #tpu.pipeline_mode<synchronous>, transform_indices = @transform_2, window_bounds = array<i64: 1, 32>}, {pipeline_mode = #tpu.pipeline_mode<synchronous>, transform_indices = @transform_3, window_bounds = array<i64: 2, 32>}, {pipeline_mode = #tpu.pipeline_mode<synchronous>, transform_indices = @transform_4, window_bounds = array<i64: 2, 1>}, {transform_indices = @transform_5, window_bounds = array<i64: 2, 64>}]} {
    %c0 = arith.constant 0 : index
    %c0_0 = arith.constant 0 : index
    %0 = vector.load %arg1[%c0, %c0_0] : memref<64x16xf32, #tpu.memory_space<vmem>>, vector<64x16xf32>
    %c0_1 = arith.constant 0 : index
    %c0_2 = arith.constant 0 : index
    %1 = vector.load %arg2[%c0_1, %c0_2] : memref<32x16xf32, #tpu.memory_space<vmem>>, vector<32x16xf32>
    %c0_3 = arith.constant 0 : index
    %c0_4 = arith.constant 0 : index
    %2 = vector.load %arg3[%c0_3, %c0_4] : memref<1x32xf32, #tpu.memory_space<vmem>>, vector<1x32xf32>
    %cst = arith.constant dense<0.000000e+00> : vector<64x32xf32>
    %3 = tpu.matmul %0, %1, %cst {dimension_numbers = #tpu.dot_dimension_numbers<[1], [1], [0], [0], [0, 0, 1, 0], [], []>} : vector<64x16xf32>, vector<32x16xf32>, vector<64x32xf32> -> vector<64x32xf32>
    %4 = vector.broadcast %2 : vector<1x32xf32> to vector<64x32xf32>
    %5 = arith.addf %3, %4 : vector<64x32xf32>
    %cst_5 = arith.constant 0.000000e+00 : f32
    %6 = vector.broadcast %cst_5 : f32 to vector<64x32xf32>
    %7 = arith.maximumf %5, %6 : vector<64x32xf32>
    %c0_6 = arith.constant 0 : index
    %c0_7 = arith.constant 0 : index
    %8 = vector.load %arg4[%c0_6, %c0_7] : memref<2x32xf32, #tpu.memory_space<vmem>>, vector<2x32xf32>
    %c0_8 = arith.constant 0 : index
    %c0_9 = arith.constant 0 : index
    %9 = vector.load %arg5[%c0_8, %c0_9] : memref<2x1xf32, #tpu.memory_space<vmem>>, vector<2x1xf32>
    %cst_10 = arith.constant dense<0.000000e+00> : vector<2x64xf32>
    %10 = tpu.matmul %8, %7, %cst_10 {dimension_numbers = #tpu.dot_dimension_numbers<[1], [1], [0], [0], [0, 0, 1, 0], [], []>} : vector<2x32xf32>, vector<64x32xf32>, vector<2x64xf32> -> vector<2x64xf32>
    %11 = vector.broadcast %9 : vector<2x1xf32> to vector<2x64xf32>
    %12 = arith.addf %10, %11 : vector<2x64xf32>
    %c0_11 = arith.constant 0 : index
    %c0_12 = arith.constant 0 : index
    %13 = vector.load %arg6[%c0_11, %c0_12] : memref<2x64xf32, #tpu.memory_space<vmem>>, vector<2x64xf32>
    tpu.vector_store %arg6[%c0_11, %c0_12], %12 {strides = array<i32>} : memref<2x64xf32, #tpu.memory_space<vmem>>, vector<2x64xf32>,
    return
  }
  func.func @transform_0(%arg0: i32) -> (i32, i32) {
    %c0_i32 = arith.constant 0 : i32
    %c0_i32_0 = arith.constant 0 : i32
    return %arg0, %c0_i32 : i32, i32
  }
  func.func @transform_1(%arg0: i32) -> (i32, i32) {
    %c0_i32 = arith.constant 0 : i32
    %c0_i32_0 = arith.constant 0 : i32
    %c0_i32_1 = arith.constant 0 : i32
    return %c0_i32, %c0_i32_0 : i32, i32
  }
  func.func @transform_2(%arg0: i32) -> (i32, i32) {
    %c0_i32 = arith.constant 0 : i32
    %c0_i32_0 = arith.constant 0 : i32
    %c0_i32_1 = arith.constant 0 : i32
    return %c0_i32, %c0_i32_0 : i32, i32
  }
  func.func @transform_3(%arg0: i32) -> (i32, i32) {
    %c0_i32 = arith.constant 0 : i32
    %c0_i32_0 = arith.constant 0 : i32
    %c0_i32_1 = arith.constant 0 : i32
    return %c0_i32, %c0_i32_0 : i32, i32
  }
  func.func @transform_4(%arg0: i32) -> (i32, i32) {
    %c0_i32 = arith.constant 0 : i32
    %c0_i32_0 = arith.constant 0 : i32
    %c0_i32_1 = arith.constant 0 : i32
    return %c0_i32, %c0_i32_0 : i32, i32
  }
  func.func @transform_5(%arg0: i32) -> (i32, i32) {
    %c0_i32 = arith.constant 0 : i32
    %c0_i32_0 = arith.constant 0 : i32
    return %c0_i32, %arg0 : i32, i32
  }
}

</mosaic_0001>

<bundles_post_ra>
// kernel: tpu_custom_call.1
= control target key start
LH: loop header
LB: loop body
LE: loop exit
PB: predicated region body
PF: predicated region fallthrough
CT: control target
= control target key end

     0   :  { %vm37_vm0 = vcmask 130048   ;;  %s364_s0 = inlined_call_operand.vmem [shape: f32[64,16], index: 0, kind: input, shape index: {}]   ;;  %s365_s1 = inlined_call_operand.vmem [shape: f32[32,16], index: 1, kind: input, shape index: {}]   ;;  %s366_s2 = inlined_call_operand.vmem [shape: f32[1,32], index: 2, kind: input, shape index: {}]   ;;  %s367_s3 = inlined_call_operand.vmem [shape: f32[2,32], index: 3, kind: input, shape index: {}]   ;;  %s368_s4 = inlined_call_operand.vmem [shape: f32[2,1], index: 4, kind: input, shape index: {}]   ;;  %s369_s5 = inlined_call_operand.hbm [shape: f32[2,64], index: 5, kind: output, shape index: {}]  }
   0x1   :  { %v32_v0 = vld [vmem:[%s365_s1 + $0x18] sm:$0xff]  ;;  %v31_v1 = vld [vmem:[%s365_s1 + $0x10] sm:$0xff] }
   0x2   :  { %217 = vmatpush.xpose.msk.msra.mxu2 %vm37_vm0, %v32_v0  ;;  %218 = vmatpush.xpose.msk.msra.mxu3 %vm37_vm0, %v32_v0 }
   0x3   :  { %196 = vmatpush.xpose.msk.msra.mxu0 %vm37_vm0, %v32_v0 }
   0x4   :  { %10 = vsyncpa [#allocation3], 0  ;;  %v30_v2 = vld [vmem:[%s365_s1 + $0x8] sm:$0xff]  ;;  %v29_v3 = vld [vmem:[%s365_s1] sm:$0xff]  ;;  %vm130_vm1 = vcmask 261120   ;;  %v255_v23 = vmov 0  }
   0x5   :  { %v24_v4 = vld [vmem:[%s364_s0 + $0x18] sm:$0xff]  ;;  %v27_v5 = vld [vmem:[%s364_s0 + $0x30] sm:$0xff]  ;;  %v21_v6 = vld [vmem:[%s364_s0] sm:$0xff]  ;;  %227 = vset.pattern.permute.xlu0 %v255_v23  ;;  %s256_s19 = smov [#allocation2]   ;;  %s187_s23 = sshll.u32 %s369_s5, 4  ;;  %vm178_vm2 = vcmask 517120   ;;  %s188_s23 = int_to_ptr.hbm [resolvable:$true] %s187_s23 }
   0x6   :  { %219 = vmatpush.xpose.msk.msra.mxu2 %vm37_vm0, %v31_v1  ;;  %220 = vmatpush.xpose.msk.msra.mxu3 %vm37_vm0, %v31_v1  ;;  %v25_v7 = vld [vmem:[%s364_s0 + $0x20] sm:$0xff]  ;;  %v28_v8 = vld [vmem:[%s364_s0 + $0x38] sm:$0xff]  ;;  %v22_v9 = vld [vmem:[%s364_s0 + $0x8] sm:$0xff]  ;;  %s185_s20 = sshll.u32 %s256_s19, 4  ;;  %s186_s20 = int_to_ptr.vmem [resolvable:$true] %s185_s20 }
   0x7   :  { %197 = vmatpush.xpose.msk.msra.mxu0 %vm37_vm0, %v31_v1  ;;  %v26_v10 = vld [vmem:[%s364_s0 + $0x28] sm:$0xff]  ;;  %v23_v11 = vld [vmem:[%s364_s0 + $0x10] sm:$0xff]  ;;  %v228_v15 = vld [vmem:[%s366_s2] ss:$0 sm:$0xff] }
   0x8   :  { %v124_v22 = vld [vmem:[%s368_s4] sm:$0x3] }
   0x9   :  { %127 = vperm.xlu0 %227, %v124_v22   ;;  %v123_v39 = vld [vmem:[%s367_s3] sm:$0x3] }
   0xa   :  { %221 = vmatpush.xpose.msk.msra.mxu2 %vm37_vm0, %v30_v2  ;;  %222 = vmatpush.xpose.msk.msra.mxu3 %vm37_vm0, %v30_v2 }
   0xb   :  { %198 = vmatpush.xpose.msk.msra.mxu0 %vm37_vm0, %v30_v2 }
   0xe   :  { %223 = vmatpush.xpose.msk.msra.mxu2 %vm37_vm0, %v29_v3  ;;  %224 = vmatpush.xpose.msk.msra.mxu3 %vm37_vm0, %v29_v3 }
   0xf   :  { %199 = vmatpush.xpose.msk.msra.mxu0 %vm37_vm0, %v29_v3 }
  0x11   :  { %203 = vmatmul.msk.f32.vlgmr.msra.gmra.mxu2 %vm37_vm0, %v24_v4  ;;  %206 = vmatmul.msk.f32.vlgmr.msra.gmra.mxu3 %vm37_vm0, %v27_v5 }
  0x12   :  { %200 = vmatmul.msk.f32.vlgmr.msra.gmra.mxu0 %vm37_vm0, %v21_v6 }
  0x19   :  { %204 = vmatmul.msk.f32.gmra.mxu2 %vm37_vm0, %v25_v7  ;;  %207 = vmatmul.msk.f32.gmra.mxu3 %vm37_vm0, %v28_v8 }
  0x1a   :  { %201 = vmatmul.msk.f32.gmra.mxu0 %vm37_vm0, %v22_v9 }
  0x21   :  { %205 = vmatmul.msk.f32.gmra.mxu2 %vm37_vm0, %v26_v10 }
  0x22   :  { %202 = vmatmul.msk.f32.gmra.mxu0 %vm37_vm0, %v23_v11 }
  0x7b   :  { %v128_v40 = vpop.permute.xlu0 %127 }
  0x8f   :  { %v91_v14 = vpop.f32.mrf.mxu0 }
  0x90   :  { %v92_v36 = vadd.f32 %v228_v15, %v91_v14 }
  0x92   :  { %v115_v38 = vmax.f32 %v92_v36, 0.0 }
  0x94   :  { %v100_v12 = vpop.f32.mrf.mxu2  ;;  %v109_v13 = vpop.f32.mrf.mxu3 }
  0x95   :  { %v110_v19 = vadd.f32 %v228_v15, %v109_v13  ;;  %v101_v30 = vadd.f32 %v228_v15, %v100_v12 }
  0x97   :  { %v94_v21 = vpop.f32.mrf.mxu0  ;;  %v121_v24 = vmax.f32 %v110_v19, 0.0  ;;  %v118_v33 = vmax.f32 %v101_v30, 0.0 }
  0x98   :  { %v95_v35 = vadd.f32 %v228_v15, %v94_v21 }
  0x9a   :  { %v116_v37 = vmax.f32 %v95_v35, 0.0 }
  0x9c   :  { %v103_v16 = vpop.f32.mrf.mxu2  ;;  %v112_v17 = vpop.f32.mrf.mxu3 }
  0x9d   :  { %v113_v18 = vadd.f32 %v228_v15, %v112_v17  ;;  %v104_v27 = vadd.f32 %v228_v15, %v103_v16 }
  0x9f   :  { %v122_v20 = vmax.f32 %v113_v18, 0.0  ;;  %v97_v29 = vpop.f32.mrf.mxu0  ;;  %v119_v31 = vmax.f32 %v104_v27, 0.0 }
  0xa0   :  { %v98_v32 = vadd.f32 %v228_v15, %v97_v29 }
  0xa1   :  { %208 = vmatpush.xpose.msk.msra.mxu1 %vm130_vm1, %v122_v20 }
  0xa2   :  { %v117_v34 = vmax.f32 %v98_v32, 0.0 }
  0xa4   :  { %v106_v25 = vpop.f32.mrf.mxu2 }
  0xa5   :  { %v107_v26 = vadd.f32 %v228_v15, %v106_v25  ;;  %209 = vmatpush.xpose.msk.msra.mxu1 %vm130_vm1, %v121_v24 }
  0xa7   :  { %v120_v28 = vmax.f32 %v107_v26, 0.0 }
  0xa9   :  { %210 = vmatpush.xpose.msk.msra.mxu1 %vm130_vm1, %v120_v28 }
  0xad   :  { %211 = vmatpush.xpose.msk.msra.mxu1 %vm130_vm1, %v119_v31 }
  0xb1   :  { %212 = vmatpush.xpose.msk.msra.mxu1 %vm130_vm1, %v118_v33 }
  0xb5   :  { %213 = vmatpush.xpose.msk.msra.mxu1 %vm130_vm1, %v117_v34 }
  0xb9   :  { %214 = vmatpush.xpose.msk.msra.mxu1 %vm130_vm1, %v116_v37 }
  0xbd   :  { %215 = vmatpush.xpose.msk.msra.mxu1 %vm130_vm1, %v115_v38 }
  0xc0   :  { %216 = vmatmul.msk.f32.vlgmr.msra.gmra.mxu1 %vm130_vm1, %v123_v39 }
 0x13d   :  { %v175_v41 = vpop.f32.mrf.mxu1 }
 0x13e   :  { %v176_v42 = vadd.f32 %v175_v41, %v128_v40 }
 0x140   :  { %179 = vst.msk [vmem:[#allocation2] sm:$0x3] %vm178_vm2, %v176_v42 }
 0x141   :  { %190 = dma.vmem_to_hbm [thread:$0]  %s186_s20, 32, %s188_s23, [#allocation3]  }
 0x142   :  { %253 = dma.done.wait [#allocation3], 32  }
 0x143   :  { %254 = vsyncadd [#allocation3], 4294967264 }
 0x144   :  { %195 = vsyncpa [#allocation3], 1 }

</bundles_post_ra>
